<compile_context>
chip_gen: v7x
topology: tpu7x:2x2x1
jax: 0.10.0
libtpu: 0.0.40
codegen_flags: <defaults>
</compile_context>

<pallas_src>
import jax
import jax.numpy as jnp
from jax.experimental import pallas as pl
from jax.experimental.pallas import tpu as pltpu

LN_EPS = 1e-5        # PyTorch nn.LayerNorm default
TB_MAX = 1024        # max batch-tile rows (double-buffered tiles ~1.5 MiB)


def _round_up(x, m):
    return ((x + m - 1) // m) * m


def _layernorm(x, gamma, beta):
    """Two-pass LayerNorm over the last axis, f32 math, biased variance."""
    mu = jnp.mean(x, axis=-1, keepdims=True)
    xc = x - mu
    var = jnp.mean(xc * xc, axis=-1, keepdims=True)
    return xc * jax.lax.rsqrt(var + LN_EPS) * gamma + beta


def _actor_kernel(x_ref, w1_ref, w2_ref, w3_ref, pk_ref, o_ref):
    # Static feature sizes from the ref shapes.
    h1 = w1_ref.shape[1]
    h2 = w2_ref.shape[1]
    npad = w3_ref.shape[1]

    # bf16 MXU feed; all accumulation / LayerNorm math stays in f32.
    x = x_ref[...].astype(jnp.bfloat16)                    # (TB, state_dim)

    # Layer 1: Linear -> ReLU -> LayerNorm
    h = jnp.dot(x, w1_ref[...], preferred_element_type=jnp.float32)
    h = jnp.maximum(h + pk_ref[0:1, :h1], 0.0)
    h = _layernorm(h, pk_ref[1:2, :h1], pk_ref[2:3, :h1])

    # Layer 2: Linear -> ReLU -> LayerNorm
    h = jnp.dot(h.astype(jnp.bfloat16), w2_ref[...],
                preferred_element_type=jnp.float32)
    h = jnp.maximum(h + pk_ref[3:4, :h2], 0.0)
    h = _layernorm(h, pk_ref[4:5, :h2], pk_ref[5:6, :h2])

    # Output head: Linear -> max_action * tanh (lane-dense, padded to npad)
    a = jnp.dot(h.astype(jnp.bfloat16), w3_ref[...],
                preferred_element_type=jnp.float32)
    a = a + pk_ref[6:7, :npad]
    max_action = pk_ref[7:8, 0:1]                          # (1,1) broadcast
    o_ref[...] = (max_action * jnp.tanh(a)).astype(o_ref.dtype)


def prepare_params(params, max_action=1.0):
    """One-time packing: call once per parameter update, NOT per forward.

    params: w1 (S,H1), w2 (H1,H2), w3 (H2,A) float32 (stored (in,out));
            b1/g1/be1 (H1,), b2/g2/be2 (H2,), b3 (A,) float32.
    """
    state_dim, h1 = params["w1"].shape
    h2 = params["w2"].shape[1]
    a_dim = params["w3"].shape[1]
    npad = _round_up(a_dim, 128)            # lane-dense output width
    w = max(h1, h2, npad)                   # packed-param lane width

    def row(v, n):
        v = jnp.asarray(v, jnp.float32).reshape(-1)
        return jnp.pad(v, (0, w - n))

    ma_row = jnp.zeros((w,), jnp.float32).at[0].set(
        jnp.asarray(max_action, jnp.float32))
    packed = jnp.stack([
        row(params["b1"], h1), row(params["g1"], h1), row(params["be1"], h1),
        row(params["b2"], h2), row(params["g2"], h2), row(params["be2"], h2),
        row(params["b3"], a_dim), ma_row,
    ])                                                     # (8, w) f32

    w3p = jnp.pad(params["w3"].astype(jnp.bfloat16),
                  ((0, 0), (0, npad - a_dim)))             # (h2, npad) bf16

    return {
        "w1": params["w1"].astype(jnp.bfloat16),
        "w2": params["w2"].astype(jnp.bfloat16),
        "w3p": w3p,
        "packed": packed,
        "dims": (state_dim, h1, h2, a_dim, npad, w),       # static python ints
    }


def _pick_batch_tile(B):
    b8 = _round_up(B, 8)
    if b8 <= 256:
        return b8                                  # tiny batch: single step
    if b8 <= 2 * TB_MAX:
        # >=2 grid steps so ("parallel",) can use both v7x TensorCores.
        return _round_up((b8 + 1) // 2, 8)
    return TB_MAX


def deterministic_actor_forward(state, prepared):
    """state: (B, state_dim) f32. prepared: output of prepare_params()."""
    B, state_dim = state.shape
    s_dim, h1, h2, a_dim, npad, w = prepared["dims"]
    assert state_dim == s_dim

    tb = _pick_batch_tile(B)
    b_pad = _round_up(B, tb)
    # TODO(synk): for very large misaligned B this pads the whole input; a
    # partial-tail-tile path would avoid the extra HBM copy.
    xs = state if b_pad == B else jnp.pad(state, ((0, b_pad - B), (0, 0)))
    grid = (b_pad // tb,)

    out = pl.pallas_call(
        _actor_kernel,
        out_shape=jax.ShapeDtypeStruct((b_pad, npad), jnp.bfloat16),
        grid_spec=pltpu.PrefetchScalarGridSpec(
            num_scalar_prefetch=0,
            grid=grid,
            in_specs=[
                pl.BlockSpec((tb, state_dim), lambda i: (i, 0)),  # activations
                pl.BlockSpec((state_dim, h1), lambda i: (0, 0)),  # w1 (resident)
                pl.BlockSpec((h1, h2), lambda i: (0, 0)),         # w2 (resident)
                pl.BlockSpec((h2, npad), lambda i: (0, 0)),       # w3 (resident)
                pl.BlockSpec((8, w), lambda i: (0, 0)),           # packed params
            ],
            out_specs=pl.BlockSpec((tb, npad), lambda i: (i, 0)),
        ),
        compiler_params=pltpu.CompilerParams(
            dimension_semantics=("parallel",)),
    )(xs, prepared["w1"], prepared["w2"], prepared["w3p"], prepared["packed"])

    return out[:B, :a_dim].astype(jnp.float32)


# ----------------------------- init & reference -----------------------------

def xavier_uniform(key, fan_in, fan_out):
    """nn.init.xavier_uniform_ on torch weight (out,in), returned (in,out) f32."""
    bound = (6.0 / (fan_in + fan_out)) ** 0.5
    wt = jax.random.uniform(key, (fan_out, fan_in), jnp.float32, -bound, bound)
    return wt.T


def init_params(key, state_dim, action_dim, hidden_dims):
    h1, h2 = hidden_dims
    k1, k2, k3 = jax.random.split(key, 3)
    return {
        "w1": xavier_uniform(k1, state_dim, h1),
        "b1": jnp.zeros((h1,), jnp.float32),
        "g1": jnp.ones((h1,), jnp.float32),
        "be1": jnp.zeros((h1,), jnp.float32),
        "w2": xavier_uniform(k2, h1, h2),
        "b2": jnp.zeros((h2,), jnp.float32),
        "g2": jnp.ones((h2,), jnp.float32),
        "be2": jnp.zeros((h2,), jnp.float32),
        "w3": xavier_uniform(k3, h2, action_dim),
        "b3": jnp.zeros((action_dim,), jnp.float32),
    }


def reference_forward(state, params, max_action=1.0):
    """Pure-JAX reference with the same dtype policy as the kernel
    (bf16 matmul operands, f32 accumulate + LayerNorm, bf16 output)."""
    def lin(x, w, b):
        return jnp.dot(x.astype(jnp.bfloat16), w.astype(jnp.bfloat16),
                       preferred_element_type=jnp.float32) + b[None, :]
    h = jnp.maximum(lin(state, params["w1"], params["b1"]), 0.0)
    h = _layernorm(h, params["g1"][None, :], params["be1"][None, :])
    h = jnp.maximum(lin(h, params["w2"], params["b2"]), 0.0)
    h = _layernorm(h, params["g2"][None, :], params["be2"][None, :])
    a = max_action * jnp.tanh(lin(h, params["w3"], params["b3"]))
    return a.astype(jnp.bfloat16).astype(jnp.float32)


if __name__ == "__main__":
    key = jax.random.PRNGKey(0)
    k_params, k_state, k_state2 = jax.random.split(key, 3)

    state_dim, action_dim = 16, 8
    hidden_dims = [128, 128]
    max_action = 1.5

    params = init_params(k_params, state_dim, action_dim, hidden_dims)
    prepared = prepare_params(params, max_action)   # one-time packing

    # Small batch (single grid step)
    batch = 8
    state = jax.random.normal(k_state, (batch, state_dim), jnp.float32)
    out = jax.block_until_ready(deterministic_actor_forward(state, prepared))
    ref = reference_forward(state, params, max_action)
    assert out.shape == (batch, action_dim)
    assert jnp.allclose(out, ref, atol=2e-2, rtol=2e-2)

    # Larger batch (exercises grid, batch tiling, output slice)
    batch2 = 200
    state2 = jax.random.normal(k_state2, (batch2, state_dim), jnp.float32)
    out2 = jax.block_until_ready(deterministic_actor_forward(state2, prepared))
    ref2 = reference_forward(state2, params, max_action)
    assert out2.shape == (batch2, action_dim)
    assert jnp.allclose(out2, ref2, atol=2e-2, rtol=2e-2)

    print("KERNEL_OK")
</pallas_src>

<mosaic_0001>
module attributes {stable_mosaic.version = 11 : i64} {
  func.func @_actor_kernel(%arg0: i32, %arg1: memref<8x16xf32, #tpu.memory_space<vmem>>, %arg2: memref<16x128xbf16, #tpu.memory_space<vmem>>, %arg3: memref<128x128xbf16, #tpu.memory_space<vmem>>, %arg4: memref<128x128xbf16, #tpu.memory_space<vmem>>, %arg5: memref<8x128xf32, #tpu.memory_space<vmem>>, %arg6: memref<8x128xbf16, #tpu.memory_space<vmem>>) attributes {dimension_semantics = [#tpu.dimension_semantics<parallel>], iteration_bounds = array<i64: 1>, scalar_prefetch = 0 : i64, scratch_operands = 0 : i64, tpu.core_type = #tpu.core_type<tc>, window_params = [{transform_indices = @transform_0, window_bounds = array<i64: 8, 16>}, {pipeline_mode = #tpu.pipeline_mode<synchronous>, transform_indices = @transform_1, window_bounds = array<i64: 16, 128>}, {pipeline_mode = #tpu.pipeline_mode<synchronous>, transform_indices = @transform_2, window_bounds = array<i64: 128, 128>}, {pipeline_mode = #tpu.pipeline_mode<synchronous>, transform_indices = @transform_3, window_bounds = array<i64: 128, 128>}, {pipeline_mode = #tpu.pipeline_mode<synchronous>, transform_indices = @transform_4, window_bounds = array<i64: 8, 128>}, {transform_indices = @transform_5, window_bounds = array<i64: 8, 128>}]} {
    %c0 = arith.constant 0 : index
    %c0_0 = arith.constant 0 : index
    %0 = vector.load %arg1[%c0, %c0_0] : memref<8x16xf32, #tpu.memory_space<vmem>>, vector<8x16xf32>
    %1 = arith.truncf %0 : vector<8x16xf32> to vector<8x16xbf16>
    %c0_1 = arith.constant 0 : index
    %c0_2 = arith.constant 0 : index
    %2 = vector.load %arg2[%c0_1, %c0_2] : memref<16x128xbf16, #tpu.memory_space<vmem>>, vector<16x128xbf16>
    %cst = arith.constant dense<0.000000e+00> : vector<8x128xf32>
    %3 = tpu.matmul %1, %2, %cst {dimension_numbers = #tpu.dot_dimension_numbers<[1], [0], [0], [1], [0, 0, 1, 1], [], []>} : vector<8x16xbf16>, vector<16x128xbf16>, vector<8x128xf32> -> vector<8x128xf32>
    %c0_3 = arith.constant 0 : index
    %c0_4 = arith.constant 0 : index
    %4 = vector.load %arg5[%c0_3, %c0_4] : memref<8x128xf32, #tpu.memory_space<vmem>>, vector<1x128xf32>
    %5 = vector.broadcast %4 : vector<1x128xf32> to vector<8x128xf32>
    %6 = arith.addf %3, %5 : vector<8x128xf32>
    %cst_5 = arith.constant 0.000000e+00 : f32
    %7 = vector.broadcast %cst_5 : f32 to vector<8x128xf32>
    %8 = arith.maximumf %6, %7 : vector<8x128xf32>
    %c1 = arith.constant 1 : index
    %c0_6 = arith.constant 0 : index
    %9 = vector.load %arg5[%c1, %c0_6] : memref<8x128xf32, #tpu.memory_space<vmem>>, vector<1x128xf32>
    %c2 = arith.constant 2 : index
    %c0_7 = arith.constant 0 : index
    %10 = vector.load %arg5[%c2, %c0_7] : memref<8x128xf32, #tpu.memory_space<vmem>>, vector<1x128xf32>
    %cst_8 = arith.constant dense<0.000000e+00> : vector<8xf32>
    %11 = vector.multi_reduction <add>, %8, %cst_8 [1] : vector<8x128xf32> to vector<8xf32>
    %12 = vector.shape_cast %11 : vector<8xf32> to vector<8x1xf32>
    %cst_9 = arith.constant 1.280000e+02 : f32
    %13 = vector.broadcast %cst_9 : f32 to vector<8x1xf32>
    %14 = arith.divf %12, %13 : vector<8x1xf32>
    %15 = vector.broadcast %14 : vector<8x1xf32> to vector<8x128xf32>
    %16 = arith.subf %8, %15 : vector<8x128xf32>
    %17 = arith.mulf %16, %16 : vector<8x128xf32>
    %cst_10 = arith.constant dense<0.000000e+00> : vector<8xf32>
    %18 = vector.multi_reduction <add>, %17, %cst_10 [1] : vector<8x128xf32> to vector<8xf32>
    %19 = vector.shape_cast %18 : vector<8xf32> to vector<8x1xf32>
    %cst_11 = arith.constant 1.280000e+02 : f32
    %20 = vector.broadcast %cst_11 : f32 to vector<8x1xf32>
    %21 = arith.divf %19, %20 : vector<8x1xf32>
    %cst_12 = arith.constant 9.99999974E-6 : f32
    %22 = vector.broadcast %cst_12 : f32 to vector<8x1xf32>
    %23 = arith.addf %21, %22 : vector<8x1xf32>
    %24 = math.rsqrt %23 : vector<8x1xf32>
    %25 = vector.broadcast %24 : vector<8x1xf32> to vector<8x128xf32>
    %26 = arith.mulf %16, %25 : vector<8x128xf32>
    %27 = vector.broadcast %9 : vector<1x128xf32> to vector<8x128xf32>
    %28 = arith.mulf %26, %27 : vector<8x128xf32>
    %29 = vector.broadcast %10 : vector<1x128xf32> to vector<8x128xf32>
    %30 = arith.addf %28, %29 : vector<8x128xf32>
    %31 = arith.truncf %30 : vector<8x128xf32> to vector<8x128xbf16>
    %c0_13 = arith.constant 0 : index
    %c0_14 = arith.constant 0 : index
    %32 = vector.load %arg3[%c0_13, %c0_14] : memref<128x128xbf16, #tpu.memory_space<vmem>>, vector<128x128xbf16>
    %cst_15 = arith.constant dense<0.000000e+00> : vector<8x128xf32>
    %33 = tpu.matmul %31, %32, %cst_15 {dimension_numbers = #tpu.dot_dimension_numbers<[1], [0], [0], [1], [0, 0, 1, 1], [], []>} : vector<8x128xbf16>, vector<128x128xbf16>, vector<8x128xf32> -> vector<8x128xf32>
    %c3 = arith.constant 3 : index
    %c0_16 = arith.constant 0 : index
    %34 = vector.load %arg5[%c3, %c0_16] : memref<8x128xf32, #tpu.memory_space<vmem>>, vector<1x128xf32>
    %35 = vector.broadcast %34 : vector<1x128xf32> to vector<8x128xf32>
    %36 = arith.addf %33, %35 : vector<8x128xf32>
    %cst_17 = arith.constant 0.000000e+00 : f32
    %37 = vector.broadcast %cst_17 : f32 to vector<8x128xf32>
    %38 = arith.maximumf %36, %37 : vector<8x128xf32>
    %c4 = arith.constant 4 : index
    %c0_18 = arith.constant 0 : index
    %39 = vector.load %arg5[%c4, %c0_18] : memref<8x128xf32, #tpu.memory_space<vmem>>, vector<1x128xf32>
    %c5 = arith.constant 5 : index
    %c0_19 = arith.constant 0 : index
    %40 = vector.load %arg5[%c5, %c0_19] : memref<8x128xf32, #tpu.memory_space<vmem>>, vector<1x128xf32>
    %cst_20 = arith.constant dense<0.000000e+00> : vector<8xf32>
    %41 = vector.multi_reduction <add>, %38, %cst_20 [1] : vector<8x128xf32> to vector<8xf32>
    %42 = vector.shape_cast %41 : vector<8xf32> to vector<8x1xf32>
    %cst_21 = arith.constant 1.280000e+02 : f32
    %43 = vector.broadcast %cst_21 : f32 to vector<8x1xf32>
    %44 = arith.divf %42, %43 : vector<8x1xf32>
    %45 = vector.broadcast %44 : vector<8x1xf32> to vector<8x128xf32>
    %46 = arith.subf %38, %45 : vector<8x128xf32>
    %47 = arith.mulf %46, %46 : vector<8x128xf32>
    %cst_22 = arith.constant dense<0.000000e+00> : vector<8xf32>
    %48 = vector.multi_reduction <add>, %47, %cst_22 [1] : vector<8x128xf32> to vector<8xf32>
    %49 = vector.shape_cast %48 : vector<8xf32> to vector<8x1xf32>
    %cst_23 = arith.constant 1.280000e+02 : f32
    %50 = vector.broadcast %cst_23 : f32 to vector<8x1xf32>
    %51 = arith.divf %49, %50 : vector<8x1xf32>
    %cst_24 = arith.constant 9.99999974E-6 : f32
    %52 = vector.broadcast %cst_24 : f32 to vector<8x1xf32>
    %53 = arith.addf %51, %52 : vector<8x1xf32>
    %54 = math.rsqrt %53 : vector<8x1xf32>
    %55 = vector.broadcast %54 : vector<8x1xf32> to vector<8x128xf32>
    %56 = arith.mulf %46, %55 : vector<8x128xf32>
    %57 = vector.broadcast %39 : vector<1x128xf32> to vector<8x128xf32>
    %58 = arith.mulf %56, %57 : vector<8x128xf32>
    %59 = vector.broadcast %40 : vector<1x128xf32> to vector<8x128xf32>
    %60 = arith.addf %58, %59 : vector<8x128xf32>
    %61 = arith.truncf %60 : vector<8x128xf32> to vector<8x128xbf16>
    %c0_25 = arith.constant 0 : index
    %c0_26 = arith.constant 0 : index
    %62 = vector.load %arg4[%c0_25, %c0_26] : memref<128x128xbf16, #tpu.memory_space<vmem>>, vector<128x128xbf16>
    %cst_27 = arith.constant dense<0.000000e+00> : vector<8x128xf32>
    %63 = tpu.matmul %61, %62, %cst_27 {dimension_numbers = #tpu.dot_dimension_numbers<[1], [0], [0], [1], [0, 0, 1, 1], [], []>} : vector<8x128xbf16>, vector<128x128xbf16>, vector<8x128xf32> -> vector<8x128xf32>
    %c6 = arith.constant 6 : index
    %c0_28 = arith.constant 0 : index
    %64 = vector.load %arg5[%c6, %c0_28] : memref<8x128xf32, #tpu.memory_space<vmem>>, vector<1x128xf32>
    %65 = vector.broadcast %64 : vector<1x128xf32> to vector<8x128xf32>
    %66 = arith.addf %63, %65 : vector<8x128xf32>
    %c7 = arith.constant 7 : index
    %c0_29 = arith.constant 0 : index
    %67 = vector.load %arg5[%c7, %c0_29] : memref<8x128xf32, #tpu.memory_space<vmem>>, vector<1x1xf32>
    %68 = math.tanh %66 : vector<8x128xf32>
    %69 = vector.broadcast %67 : vector<1x1xf32> to vector<8x128xf32>
    %70 = arith.mulf %69, %68 : vector<8x128xf32>
    %71 = arith.truncf %70 : vector<8x128xf32> to vector<8x128xbf16>
    %c0_30 = arith.constant 0 : index
    %c0_31 = arith.constant 0 : index
    %72 = vector.load %arg6[%c0_30, %c0_31] : memref<8x128xbf16, #tpu.memory_space<vmem>>, vector<8x128xbf16>
    tpu.vector_store %arg6[%c0_30, %c0_31], %71 {strides = array<i32>} : memref<8x128xbf16, #tpu.memory_space<vmem>>, vector<8x128xbf16>,
    return
  }
  func.func @transform_0(%arg0: i32) -> (i32, i32) {
    %c0_i32 = arith.constant 0 : i32
    %c0_i32_0 = arith.constant 0 : i32
    return %arg0, %c0_i32 : i32, i32
  }
  func.func @transform_1(%arg0: i32) -> (i32, i32) {
    %c0_i32 = arith.constant 0 : i32
    %c0_i32_0 = arith.constant 0 : i32
    %c0_i32_1 = arith.constant 0 : i32
    return %c0_i32, %c0_i32_0 : i32, i32
  }
  func.func @transform_2(%arg0: i32) -> (i32, i32) {
    %c0_i32 = arith.constant 0 : i32
    %c0_i32_0 = arith.constant 0 : i32
    %c0_i32_1 = arith.constant 0 : i32
    return %c0_i32, %c0_i32_0 : i32, i32
  }
  func.func @transform_3(%arg0: i32) -> (i32, i32) {
    %c0_i32 = arith.constant 0 : i32
    %c0_i32_0 = arith.constant 0 : i32
    %c0_i32_1 = arith.constant 0 : i32
    return %c0_i32, %c0_i32_0 : i32, i32
  }
  func.func @transform_4(%arg0: i32) -> (i32, i32) {
    %c0_i32 = arith.constant 0 : i32
    %c0_i32_0 = arith.constant 0 : i32
    %c0_i32_1 = arith.constant 0 : i32
    return %c0_i32, %c0_i32_0 : i32, i32
  }
  func.func @transform_5(%arg0: i32) -> (i32, i32) {
    %c0_i32 = arith.constant 0 : i32
    %c0_i32_0 = arith.constant 0 : i32
    return %arg0, %c0_i32 : i32, i32
  }
}

</mosaic_0001>

<bundles_post_ra>
// kernel: tpu_custom_call.1
= control target key start
LH: loop header
LB: loop body
LE: loop exit
PB: predicated region body
PF: predicated region fallthrough
CT: control target
= control target key end

     0   :  { %10 = vsyncpa [#allocation3], 0  ;;  %s824_s0 = inlined_call_operand.hbm [shape: f32[8,16], index: 0, kind: input, shape index: {}]   ;;  %s825_s1 = inlined_call_operand.hbm [shape: bf16[16,128], index: 1, kind: input, shape index: {}]   ;;  %s826_s2 = inlined_call_operand.hbm [shape: bf16[128,128], index: 2, kind: input, shape index: {}]   ;;  %s827_s3 = inlined_call_operand.hbm [shape: bf16[128,128], index: 3, kind: input, shape index: {}]   ;;  %s828_s4 = inlined_call_operand.vmem [shape: f32[8,128], index: 4, kind: input, shape index: {}]   ;;  %s829_s5 = inlined_call_operand.hbm [shape: bf16[8,128], index: 5, kind: output, shape index: {}]  }
   0x1   :  { %11 = vsyncpa [#allocation6], 0 }
   0x2   :  { %12 = vsyncpa [#allocation9], 0 }
   0x3   :  { %13 = vsyncpa [#allocation4], 0  ;;  %s672_s18 = smov [#allocation5]   ;;  %s554_s22 = scalar_lea.hbm %s825_s1, 128 }
   0x4   :  { %s29_s19 = sshll.u32 %s672_s18, 4  ;;  %p555_p0 = scmp.ne.s32.totalorder %s825_s1, %s554_s22  ;;  %s30_s19 = int_to_ptr.vmem [resolvable:$true] %s29_s19 }
   0x5   :  { %p558_p1 = scmp.lt.u32.totalorder %s554_s22, %s825_s1 }
   0x7   :  { %p560_p2 = pnand %p558_p1, %p555_p0 }
   0x9   :  { %563 = shalt.err (!%p560_p2)
}
   0xa   :  { %s564_s27 = scalar_lea.vmem %s30_s19, 128  ;;  %p569_p4 = scmp.lt.s32.totalorder %s30_s19, %s30_s19 }
   0xb   :  { %p565_p3 = scmp.ne.s32.totalorder %s30_s19, %s564_s27  ;;  %p570_p5 = scmp.lt.s32.totalorder %s564_s27, %s564_s27 }
   0xd   :  { %p571_p6 = por %p570_p5, %p569_p4 }
   0xf   :  { %p572_p7 = pnand %p571_p6, %p565_p3 }
  0x11   :  { %575 = shalt.err (!%p572_p7)
}
  0x12   :  { %s673_s28 = smov 64   ;;  %s674_s29 = smov 4  }
  0x13   :  { %35 = dma.hbm_to_vmem [thread:$0]  %s825_s1, 128, %s30_s19, [#allocation6], %s673_s28, %s673_s28, %s674_s29  }
  0x14   :  { %s675_s7 = smov [#allocation2]   ;;  %s676_s9 = smov [#allocation7]  }
  0x15   :  { %s20_s8 = sshll.u32 %s675_s7, 4  ;;  %s41_s10 = sshll.u32 %s676_s9, 4  ;;  %s21_s8 = int_to_ptr.vmem [resolvable:$true] %s20_s8  ;;  %s42_s10 = int_to_ptr.vmem [resolvable:$true] %s41_s10 }
  0x16   :  { %s576_s13 = scalar_lea.hbm %s824_s0, 128 }
  0x17   :  { %p577_p8 = scmp.ne.s32.totalorder %s824_s0, %s576_s13  ;;  %p580_p9 = scmp.lt.u32.totalorder %s576_s13, %s824_s0 }
  0x19   :  { %p582_p10 = pnand %p580_p9, %p577_p8 }
  0x1b   :  { %585 = shalt.err (!%p582_p10)
}
  0x1c   :  { %s586_s1 = scalar_lea.vmem %s21_s8, 128  ;;  %p591_p12 = scmp.lt.s32.totalorder %s21_s8, %s21_s8 }
  0x1d   :  { %p587_p11 = scmp.ne.s32.totalorder %s21_s8, %s586_s1  ;;  %p592_p13 = scmp.lt.s32.totalorder %s586_s1, %s586_s1 }
  0x1f   :  { %p593_p0 = por %p592_p13, %p591_p12 }
  0x21   :  { %p594_p1 = pnand %p593_p0, %p587_p11 }
  0x23   :  { %597 = shalt.err (!%p594_p1)
}
  0x24   :  { %23 = dma.hbm_to_vmem [thread:$0]  %s824_s0, 128, %s21_s8, [#allocation3]  }
  0x25   :  { %s598_s22 = scalar_lea.hbm %s826_s2, 1024 }
  0x26   :  { %p599_p2 = scmp.ne.s32.totalorder %s826_s2, %s598_s22  ;;  %p602_p3 = scmp.lt.u32.totalorder %s598_s22, %s826_s2 }
  0x28   :  { %p604_p4 = pnand %p602_p3, %p599_p2 }
  0x2a   :  { %607 = shalt.err (!%p604_p4)
}
  0x2b   :  { %s608_s27 = scalar_lea.vmem %s42_s10, 1024  ;;  %p613_p6 = scmp.lt.s32.totalorder %s42_s10, %s42_s10 }
  0x2c   :  { %p609_p5 = scmp.ne.s32.totalorder %s42_s10, %s608_s27  ;;  %p614_p7 = scmp.lt.s32.totalorder %s608_s27, %s608_s27 }
  0x2e   :  { %p615_p8 = por %p614_p7, %p613_p6 }
  0x30   :  { %p616_p9 = pnand %p615_p8, %p609_p5 }
  0x32   :  { %619 = shalt.err (!%p616_p9)
}
  0x33   :  { %47 = dma.hbm_to_vmem [thread:$0]  %s826_s2, 1024, %s42_s10, [#allocation6], %s673_s28, %s673_s28, %s674_s29  }
  0x34   :  { %s677_s6 = smov [#allocation8]   ;;  %s620_s11 = scalar_lea.hbm %s827_s3, 1024 }
  0x35   :  { %s53_s7 = sshll.u32 %s677_s6, 4  ;;  %p621_p10 = scmp.ne.s32.totalorder %s827_s3, %s620_s11  ;;  %s54_s7 = int_to_ptr.vmem [resolvable:$true] %s53_s7 }
  0x36   :  { %p624_p11 = scmp.lt.u32.totalorder %s620_s11, %s827_s3 }
  0x38   :  { %p626_p12 = pnand %p624_p11, %p621_p10 }
  0x3a   :  { %629 = shalt.err (!%p626_p12)
}
  0x3b   :  { %s630_s16 = scalar_lea.vmem %s54_s7, 1024  ;;  %p635_p0 = scmp.lt.s32.totalorder %s54_s7, %s54_s7 }
  0x3c   :  { %p631_p13 = scmp.ne.s32.totalorder %s54_s7, %s630_s16  ;;  %p636_p1 = scmp.lt.s32.totalorder %s630_s16, %s630_s16 }
  0x3e   :  { %p637_p2 = por %p636_p1, %p635_p0 }
  0x40   :  { %p638_p3 = pnand %p637_p2, %p631_p13 }
  0x42   :  { %641 = shalt.err (!%p638_p3)
}
  0x43   :  { %59 = dma.hbm_to_vmem [thread:$0]  %s827_s3, 1024, %s54_s7, [#allocation9], %s673_s28, %s673_s28, %s674_s29  }
  0x44   :  { %664 = dma.done.wait [#allocation3], 128  }
  0x45   :  { %665 = vsyncadd [#allocation3], 4294967168 }
  0x46   :  { %666 = dma.done.wait [#allocation6], 1152  }
  0x47   :  { %667 = vsyncadd [#allocation6], 4294966144 }
  0x48   :  { %668 = dma.done.wait [#allocation9], 1024  }
  0x49   :  { %669 = vsyncadd [#allocation9], 4294966272  ;;  %v678_v0 = vmov 0.0   ;;  %vm679_vm0 = vmmov 0   ;;  %v531_v1 = vld [vmem:[#allocation5] sm:$0xff]   ;;  %v75_v2 = vld [vmem:[#allocation2] sm:$0xff] }
  0x4a   :  { %474 = vmatprep.subr.bf16.mxu0 %v678_v0  ;;  %476 = vmatprep.mubr.msk.bf16.mxu0 %vm679_vm0, %v678_v0  ;;  %vm90_vm1 = vcmask 130048   ;;  %v76_v3 = vpack.c.bf16 %v75_v2, %v75_v2  ;;  %v429_v4 = vld [vmem:[%s828_s4] ss:$0 sm:$0xff]  ;;  %v532_v11 = vld [vmem:[#allocation7] sm:$0xff]   ;;  %v533_v12 = vld [vmem:[#allocation7 + $0x8] sm:$0xff]   ;;  %s680_s6 = smov [#allocation10]  }
  0x4b   :  { %480 = vmatprep.subr.bf16.mxu1 %v678_v0  ;;  %496 = vmatprep.mubr.msk.bf16.mxu1 %vm679_vm0, %v678_v0  ;;  %v534_v17 = vld [vmem:[#allocation7 + $0x10] sm:$0xff]   ;;  %v535_v18 = vld [vmem:[#allocation7 + $0x18] sm:$0xff]   ;;  %v536_v19 = vld [vmem:[#allocation7 + $0x20] sm:$0xff]   ;;  %s418_s7 = sshll.u32 %s680_s6, 4  ;;  %s419_s7 = int_to_ptr.vmem [resolvable:$true] %s418_s7 }
  0x4c   :  { %475 = vmatpush3.bf16.msra.mxu0 %v531_v1  ;;  %481 = vmatpush3.bf16.msra.mxu1 %v532_v11  ;;  %v537_v20 = vld [vmem:[#allocation7 + $0x28] sm:$0xff]   ;;  %v538_v21 = vld [vmem:[#allocation7 + $0x30] sm:$0xff]   ;;  %v539_v22 = vld [vmem:[#allocation7 + $0x38] sm:$0xff]   ;;  %s642_s8 = scalar_lea.vmem %s419_s7, 64  ;;  %p647_p5 = scmp.lt.s32.totalorder %s419_s7, %s419_s7 }
  0x4d   :  { %500 = vmatprep.subr.bf16.mxu0 %v678_v0  ;;  %482 = vmatprep.subr.bf16.mxu1 %v678_v0  ;;  %v432_v27 = vld [vmem:[%s828_s4 + $0x1] ss:$0 sm:$0xff]  ;;  %v433_v29 = vld [vmem:[%s828_s4 + $0x2] ss:$0 sm:$0xff]  ;;  %v434_v33 = vld [vmem:[%s828_s4 + $0x3] ss:$0 sm:$0xff]  ;;  %p643_p4 = scmp.ne.s32.totalorder %s419_s7, %s642_s8  ;;  %p648_p6 = scmp.lt.s32.totalorder %s642_s8, %s642_s8 }
  0x4e   :  { %v540_v40 = vld [vmem:[#allocation8] sm:$0xff]   ;;  %v541_v41 = vld [vmem:[#allocation8 + $0x8] sm:$0xff]   ;;  %v542_v46 = vld [vmem:[#allocation8 + $0x10] sm:$0xff]  }
  0x4f   :  { %477 = vmatmul.mubr.msk.bf16.vlgmr.msra.gmra.mrb[0].mxu0 %vm90_vm1, %v76_v3  ;;  %v543_v47 = vld [vmem:[#allocation8 + $0x18] sm:$0xff]   ;;  %v544_v48 = vld [vmem:[#allocation8 + $0x20] sm:$0xff]   ;;  %v545_v49 = vld [vmem:[#allocation8 + $0x28] sm:$0xff]   ;;  %p649_p7 = por %p648_p6, %p647_p5 }
  0x50   :  { %516 = vmatprep.mubr.msk.bf16.mxu0 %vm679_vm0, %v678_v0  ;;  %483 = vmatpush3.bf16.msra.mxu1 %v533_v12  ;;  %v546_v50 = vld [vmem:[#allocation8 + $0x30] sm:$0xff]   ;;  %v547_v51 = vld [vmem:[#allocation8 + $0x38] sm:$0xff]  }
  0x51   :  { %484 = vmatprep.subr.bf16.mxu1 %v678_v0  ;;  %501 = vmatpush3.bf16.msra.mxu0 %v540_v40  ;;  %v403_v52 = vld [vmem:[%s828_s4 + $0x7] sm:$0x1]  ;;  %v443_v57 = vld [vmem:[%s828_s4 + $0x4] ss:$0 sm:$0xff]  ;;  %v444_v59 = vld [vmem:[%s828_s4 + $0x5] ss:$0 sm:$0xff]  ;;  %p650_p8 = pnand %p649_p7, %p643_p4 }
  0x52   :  { %502 = vmatprep.subr.bf16.mxu0 %v678_v0  ;;  %520 = vpush %v403_v52  ;;  %v445_v63 = vld [vmem:[%s828_s4 + $0x6] ss:$0 sm:$0xff] }
  0x54   :  { %485 = vmatpush3.bf16.msra.mxu1 %v534_v17 }
  0x55   :  { %486 = vmatprep.subr.bf16.mxu1 %v678_v0  ;;  %503 = vmatpush3.bf16.msra.mxu0 %v541_v41 }
  0x56   :  { %504 = vmatprep.subr.bf16.mxu0 %v678_v0 }
  0x58   :  { %487 = vmatpush3.bf16.msra.mxu1 %v535_v18 }
  0x59   :  { %488 = vmatprep.subr.bf16.mxu1 %v678_v0  ;;  %505 = vmatpush3.bf16.msra.mxu0 %v542_v46 }
  0x5a   :  { %506 = vmatprep.subr.bf16.mxu0 %v678_v0 }
  0x5c   :  { %489 = vmatpush3.bf16.msra.mxu1 %v536_v19 }
  0x5d   :  { %490 = vmatprep.subr.bf16.mxu1 %v678_v0  ;;  %507 = vmatpush3.bf16.msra.mxu0 %v543_v47 }
  0x5e   :  { %508 = vmatprep.subr.bf16.mxu0 %v678_v0 }
  0x60   :  { %491 = vmatpush3.bf16.msra.mxu1 %v537_v20 }
  0x61   :  { %492 = vmatprep.subr.bf16.mxu1 %v678_v0  ;;  %509 = vmatpush3.bf16.msra.mxu0 %v544_v48 }
  0x62   :  { %510 = vmatprep.subr.bf16.mxu0 %v678_v0 }
  0x64   :  { %493 = vmatpush3.bf16.msra.mxu1 %v538_v21 }
  0x65   :  { %494 = vmatprep.subr.bf16.mxu1 %v678_v0  ;;  %511 = vmatpush3.bf16.msra.mxu0 %v545_v49 }
  0x66   :  { %512 = vmatprep.subr.bf16.mxu0 %v678_v0 }
  0x68   :  { %495 = vmatpush3.bf16.msra.mxu1 %v539_v22 }
  0x69   :  { %513 = vmatpush3.bf16.msra.mxu0 %v546_v50 }
  0x6a   :  { %514 = vmatprep.subr.bf16.mxu0 %v678_v0 }
  0x6d   :  { %515 = vmatpush3.bf16.msra.mxu0 %v547_v51 }
  0x83   :  { %s521_s30 = spop %520 }
 0x122   :  { %v128_v5 = vpop.f32.mrb[0].mxu0 }
 0x123   :  { %v129_v6 = vadd.f32 %v429_v4, %v128_v5  ;;  %v478_v7 = vpop.f32.mrb[1].mxu0  ;;  %v407_v5 = vstv %s521_s30 }
 0x124   :  { %v131_v8 = vpop.f32.mrb[2].mxu0 }
 0x125   :  { %v134_v9 = vmax.f32 %v129_v6, 0.0  ;;  %v479_v10 = vpop.f32.mrb[3].mxu0 }
 0x127   :  { %137 = vadd.xlane.f32.xlu0 %v134_v9 }
 0x1b4   :  { %v138_v13 = vpop.xlane.xlu0 %137 }
 0x1b5   :  { %v140_v14 = vmul.f32 0.0078125, %v138_v13 }
 0x1b7   :  { %v141_v15 = vsub.f32 %v134_v9, %v140_v14 }
 0x1b9   :  { %v142_v16 = vmul.f32 %v141_v15, %v141_v15 }
 0x1bb   :  { %143 = vadd.xlane.f32.xlu0 %v142_v16 }
 0x248   :  { %v144_v23 = vpop.xlane.xlu0 %143 }
 0x249   :  { %v145_v24 = vmul.f32 0.0078125, %v144_v23 }
 0x24b   :  { %v146_v25 = vadd.f32 1e-05, %v145_v24 }
 0x24d   :  { %548 = vrsqrt.f32 %v146_v25 }
 0x257   :  { %v549_v26 = vpop.eup %548 }
 0x258   :  { %v148_v28 = vmul.f32 %v549_v26, %v141_v15 }
 0x25a   :  { %v153_v30 = vmul.f32 %v432_v27, %v148_v28 }
 0x25c   :  { %v158_v31 = vadd.f32 %v433_v29, %v153_v30 }
 0x25e   :  { %v159_v32 = vpack.c.bf16 %v158_v31, %v158_v31 }
 0x260   :  { %497 = vmatmul.mubr.bf16.vlgmr.msra.gmra.mrb[0].mxu1 %v159_v32 }
 0x333   :  { %v263_v34 = vpop.f32.mrb[0].mxu1 }
 0x334   :  { %v264_v35 = vadd.f32 %v434_v33, %v263_v34  ;;  %v498_v36 = vpop.f32.mrb[1].mxu1 }
 0x335   :  { %v266_v37 = vpop.f32.mrb[2].mxu1 }
 0x336   :  { %v269_v38 = vmax.f32 %v264_v35, 0.0  ;;  %v499_v39 = vpop.f32.mrb[3].mxu1 }
 0x338   :  { %272 = vadd.xlane.f32.xlu1 %v269_v38 }
 0x3c5   :  { %v273_v42 = vpop.xlane.xlu1 %272 }
 0x3c6   :  { %v274_v43 = vmul.f32 0.0078125, %v273_v42 }
 0x3c8   :  { %v275_v44 = vsub.f32 %v269_v38, %v274_v43 }
 0x3ca   :  { %v276_v45 = vmul.f32 %v275_v44, %v275_v44 }
 0x3cc   :  { %277 = vadd.xlane.f32.xlu1 %v276_v45 }
 0x459   :  { %v278_v53 = vpop.xlane.xlu1 %277 }
 0x45a   :  { %v279_v54 = vmul.f32 0.0078125, %v278_v53 }
 0x45c   :  { %v280_v55 = vadd.f32 1e-05, %v279_v54 }
 0x45e   :  { %550 = vrsqrt.f32 %v280_v55 }
 0x468   :  { %v551_v56 = vpop.eup %550 }
 0x469   :  { %v282_v58 = vmul.f32 %v551_v56, %v275_v44 }
 0x46b   :  { %v287_v60 = vmul.f32 %v443_v57, %v282_v58 }
 0x46d   :  { %v292_v61 = vadd.f32 %v444_v59, %v287_v60 }
 0x46f   :  { %v293_v62 = vpack.c.bf16 %v292_v61, %v292_v61 }
 0x471   :  { %517 = vmatmul.mubr.bf16.vlgmr.msra.gmra.mrb[4].mxu0 %v293_v62 }
 0x544   :  { %v397_v0 = vpop.f32.mrb[4].mxu0 }
 0x545   :  { %v398_v1 = vadd.f32 %v445_v63, %v397_v0  ;;  %v518_v2 = vpop.f32.mrb[5].mxu0 }
 0x546   :  { %v400_v3 = vpop.f32.mrb[6].mxu0 }
 0x547   :  { %552 = vtanh.f32 %v398_v1  ;;  %v519_v4 = vpop.f32.mrb[7].mxu0 }
 0x551   :  { %v553_v6 = vpop.eup %552 }
 0x552   :  { %v409_v7 = vmul.f32 %v553_v6, %v407_v5 }
 0x554   :  { %v410_v8 = vpack.c.bf16 %v409_v7, %v409_v7 }
 0x556   :  { %411 = vst [vmem:[#allocation10] sm:$0xf] %v410_v8 }
 0x557   :  { %653 = shalt.err (!%p650_p8)
}
 0x558   :  { %s654_s11 = scalar_lea.hbm %s829_s5, 64 }
 0x559   :  { %p655_p9 = scmp.ne.s32.totalorder %s829_s5, %s654_s11  ;;  %p658_p10 = scmp.lt.u32.totalorder %s654_s11, %s829_s5 }
 0x55b   :  { %p660_p11 = pnand %p658_p10, %p655_p9 }
 0x55d   :  { %663 = shalt.err (!%p660_p11)
}
 0x55e   :  { %421 = dma.vmem_to_hbm [thread:$0]  %s419_s7, 64, %s829_s5, [#allocation4]  }
 0x55f   :  { %670 = dma.done.wait [#allocation4], 64  }
 0x560   :  { %671 = vsyncadd [#allocation4], 4294967232 }
 0x561   :  { %425 = vsyncpa [#allocation3], 1 }
 0x562   :  { %426 = vsyncpa [#allocation6], 1 }
 0x563   :  { %427 = vsyncpa [#allocation9], 1 }
 0x564   :  { %428 = vsyncpa [#allocation4], 1 }

</bundles_post_ra>
